<compile_context>
chip_gen: v5e
topology: v5e:2x2
jax: 0.10.0
libtpu: 0.0.40
codegen_flags: <defaults>
</compile_context>

<pallas_src>
import jax
import jax.numpy as jnp
import numpy as np
from jax.experimental import pallas as pl
from jax.experimental.pallas import tpu as pltpu


def dir_vae_kernel(x_ref, w1t_ref, b1_ref, w2t_ref, b2_ref, emt_ref,
                   recon_ref, abund_ref, alpha_ref):
    """Fused VAE forward on one (batch, pixel-tile) block.

    Layout: channels on sublanes, pixels on lanes (lane-dense outputs).
      x_ref:     (1, n_bands, T)   pixel tile (T = tile_hw, multiple of 128)
      w1t/b1:    (hidden, n_bands), (hidden, 1)   encoder layer 1 (pre-transposed)
      w2t/b2:    (n_ems, hidden),   (n_ems, 1)    encoder layer 2 -> concentrations
      emt:       (n_bands, n_ems)                 endmember matrix (pre-transposed)
      recon_ref: (1, n_bands, T)
      abund_ref: (1, n_ems, T)
      alpha_ref: (1, n_ems, T)
    """
    x = x_ref[0]                                                    # (n_bands, T)

    # Encoder: 1x1-conv MLP over the band axis (+ ReLU).
    h = jnp.dot(w1t_ref[...], x, preferred_element_type=jnp.float32) + b1_ref[...]
    h = jnp.maximum(h, 0.0)                                         # (hidden, T)

    # Dirichlet concentration parameters: stable softplus + eps (strictly > 0).
    logits = jnp.dot(w2t_ref[...], h,
                     preferred_element_type=jnp.float32) + b2_ref[...]
    alpha = jnp.logaddexp(logits, 0.0) + 1e-3                       # (n_ems, T)

    # Reparameterize (deterministic Dirichlet mean) + process_latent (identity).
    denom = jnp.sum(alpha, axis=0, keepdims=True)   # n_ems-row sublane reduce, (1, T)
    # approx=True would route this to the EUP, but loosens accuracy below the
    # 1e-5 reference tolerance; the kernel is mem-bound so exact is fine.
    inv = pl.reciprocal(denom, approx=False)
    abund = alpha * inv                             # abundances on the simplex

    # Decoder: linear mixing model  recon = E^T a  per pixel.
    recon = jnp.dot(emt_ref[...], abund, preferred_element_type=jnp.float32)

    recon_ref[0] = recon.astype(recon_ref.dtype)
    abund_ref[0] = abund.astype(abund_ref.dtype)
    alpha_ref[0] = alpha.astype(alpha_ref.dtype)


def _select_tiling(HW, B, max_tile_hw, min_parallel_steps=2):
    """Pick (tile_hw, hw_pad).

    Preference order:
      1. lane-dense tiles (multiples of 128; pad to 128 alignment if HW is not
         128-aligned — masked stores cost more than a tiny padded tail),
      2. tiles that exactly divide the lane-aligned extent (no host pad, no
         post-call slices -> no hidden XLA HBM round trip),
      3. at least `min_parallel_steps` grid steps so v7x's two TensorCores both
         get work (v5e/v6e: harmless),
      4. the largest tile satisfying the above (amortizes ~0.35 us/step).
    """
    lane_pad = pl.cdiv(HW, 128) * 128
    cap = min(max_tile_hw, lane_pad)

    # 128-multiple divisors of the lane-aligned extent, capped by max_tile_hw.
    divisors = [t for t in range(128, cap + 1, 128) if lane_pad % t == 0]
    good = [t for t in divisors if B * (lane_pad // t) >= min_parallel_steps]
    tile = max(good) if good else max(divisors)

    if tile < min(2048, cap):
        # Pathological factorization (e.g. lane_pad = 128 * prime): tiny tiles
        # run at ~30% of the HBM roofline, so accept a padded tail instead.
        tile = cap
        if B * pl.cdiv(HW, tile) < min_parallel_steps and HW > 128:
            tile = max(128, pl.cdiv(pl.cdiv(HW, min_parallel_steps), 128) * 128)

    hw_pad = pl.cdiv(HW, tile) * tile
    return tile, hw_pad


def dir_cnn_vae_forward(x_nchw, params, *, max_tile_hw=32768):
    B, n_bands, H, W = x_nchw.shape
    hidden = params["w1"].shape[1]
    n_ems = params["em"].shape[0]
    HW = H * W

    # NCHW -> [B, C, HW]: a pure (free) reshape, no transpose / extra HBM traffic.
    x = x_nchw.reshape(B, n_bands, HW)

    tile_hw, hw_pad = _select_tiling(HW, B, max_tile_hw)
    if hw_pad != HW:
        # Fallback only (non-128-aligned HW or pathological factorization):
        # zero-padded tail, sliced off after the call.
        x = jnp.pad(x, ((0, 0), (0, 0), (0, hw_pad - HW)))

    # Pre-transpose the (tiny, KB-sized) weights once so the kernel never transposes.
    w1t = params["w1"].T                    # (hidden, n_bands)
    b1c = params["b1"].reshape(hidden, 1)   # (hidden, 1)
    w2t = params["w2"].T                    # (n_ems, hidden)
    b2c = params["b2"].reshape(n_ems, 1)    # (n_ems, 1)
    emt = params["em"].T                    # (n_bands, n_ems)

    n_tiles = hw_pad // tile_hw
    grid = (B, n_tiles)

    # Explicit scoped-VMEM budget: double-buffered x/recon/abund/alpha blocks
    # plus in-kernel intermediates (h, logits, alpha, abund, recon), + headroom.
    # Clamped to [32 MiB, 56 MiB] -> always below v7x's 64 MiB physical VMEM and
    # far below v5e/v6e's 128 MiB.
    per_step_bytes = 4 * tile_hw * (2 * (2 * n_bands + 2 * n_ems)       # pipelined blocks (x2 buffers)
                                    + hidden + 3 * n_ems + n_bands + 1)  # intermediates
    vmem_limit = int(min(56 << 20, max(32 << 20, per_step_bytes + (8 << 20))))

    # Advisory cost hint for XLA's scheduler (mem-bound custom call).
    P = B * HW
    cost = pl.CostEstimate(
        flops=2 * P * (n_bands * hidden + hidden * n_ems + n_ems * n_bands),
        transcendentals=2 * P * n_ems,
        bytes_accessed=4 * P * (2 * n_bands + 2 * n_ems),
    )

    recon, abund, alpha = pl.pallas_call(
        dir_vae_kernel,
        out_shape=(
            jax.ShapeDtypeStruct((B, n_bands, hw_pad), jnp.float32),
            jax.ShapeDtypeStruct((B, n_ems, hw_pad), jnp.float32),
            jax.ShapeDtypeStruct((B, n_ems, hw_pad), jnp.float32),
        ),
        grid_spec=pltpu.PrefetchScalarGridSpec(
            num_scalar_prefetch=0,
            grid=grid,
            in_specs=[
                pl.BlockSpec((1, n_bands, tile_hw), lambda b, t: (b, 0, t)),  # x tile
                pl.BlockSpec((hidden, n_bands), lambda b, t: (0, 0)),         # w1^T (resident)
                pl.BlockSpec((hidden, 1), lambda b, t: (0, 0)),               # b1
                pl.BlockSpec((n_ems, hidden), lambda b, t: (0, 0)),           # w2^T
                pl.BlockSpec((n_ems, 1), lambda b, t: (0, 0)),                # b2
                pl.BlockSpec((n_bands, n_ems), lambda b, t: (0, 0)),          # endmembers^T
            ],
            out_specs=(
                pl.BlockSpec((1, n_bands, tile_hw), lambda b, t: (b, 0, t)),
                pl.BlockSpec((1, n_ems, tile_hw), lambda b, t: (b, 0, t)),
                pl.BlockSpec((1, n_ems, tile_hw), lambda b, t: (b, 0, t)),
            ),
        ),
        compiler_params=pltpu.CompilerParams(
            # Both axes independent -> shard across v7x's dual TensorCores.
            # (Effectively a no-op on v5e/v6e's single TC; harmless.)
            dimension_semantics=("parallel", "parallel"),
            vmem_limit_bytes=vmem_limit,
        ),
        cost_estimate=cost,
    )(x, w1t, b1c, w2t, b2c, emt)

    if hw_pad != HW:
        recon = recon[:, :, :HW]
        abund = abund[:, :, :HW]
        alpha = alpha[:, :, :HW]

    # [B, C, HW] -> NCHW: free reshapes, no transpose.
    return (recon.reshape(B, n_bands, H, W),
            abund.reshape(B, n_ems, H, W),
            alpha.reshape(B, n_ems, H, W))


def _reference_forward(x_nchw, params):
    """Pure-JAX reference for correctness check."""
    B, n_bands, H, W = x_nchw.shape
    n_ems = params["em"].shape[0]
    x = jnp.transpose(x_nchw, (0, 2, 3, 1)).reshape(-1, n_bands)
    h = jnp.maximum(x @ params["w1"] + params["b1"], 0.0)
    alpha = jnp.logaddexp(h @ params["w2"] + params["b2"], 0.0) + 1e-3
    abund = alpha / jnp.sum(alpha, axis=-1, keepdims=True)
    recon = abund @ params["em"]
    return (recon.reshape(B, H, W, n_bands).transpose(0, 3, 1, 2),
            abund.reshape(B, H, W, n_ems).transpose(0, 3, 1, 2),
            alpha.reshape(B, H, W, n_ems).transpose(0, 3, 1, 2))


if __name__ == "__main__":
    # Small shapes consistent with the module: n_bands spectral bands, n_ems endmembers.
    B, n_bands, H, W = 2, 16, 16, 16
    n_ems, hidden = 4, 32

    key = jax.random.PRNGKey(0)
    kx, k1, k2, k3, k4, k5 = jax.random.split(key, 6)

    x = jax.random.uniform(kx, (B, n_bands, H, W), dtype=jnp.float32)

    params = {
        "w1": jax.random.normal(k1, (n_bands, hidden), jnp.float32) * 0.1,
        "b1": jax.random.normal(k2, (1, hidden), jnp.float32) * 0.01,
        "w2": jax.random.normal(k3, (hidden, n_ems), jnp.float32) * 0.1,
        "b2": jax.random.normal(k4, (1, n_ems), jnp.float32) * 0.01,
        "em": jax.random.uniform(k5, (n_ems, n_bands), jnp.float32),
    }

    recon, abund, alpha = jax.block_until_ready(dir_cnn_vae_forward(x, params))

    recon_ref, abund_ref, alpha_ref = _reference_forward(x, params)
    np.testing.assert_allclose(np.asarray(recon), np.asarray(recon_ref), rtol=1e-5, atol=1e-5)
    np.testing.assert_allclose(np.asarray(abund), np.asarray(abund_ref), rtol=1e-5, atol=1e-5)
    np.testing.assert_allclose(np.asarray(alpha), np.asarray(alpha_ref), rtol=1e-5, atol=1e-5)

    print("KERNEL_OK")
</pallas_src>

<mosaic_0001>
module attributes {stable_mosaic.version = 11 : i64} {
  func.func @dir_vae_kernel(%arg0: i32, %arg1: i32, %arg2: memref<1x16x256xf32, #tpu.memory_space<vmem>>, %arg3: memref<32x16xf32, #tpu.memory_space<vmem>>, %arg4: memref<32x1xf32, #tpu.memory_space<vmem>>, %arg5: memref<4x32xf32, #tpu.memory_space<vmem>>, %arg6: memref<4x1xf32, #tpu.memory_space<vmem>>, %arg7: memref<16x4xf32, #tpu.memory_space<vmem>>, %arg8: memref<1x16x256xf32, #tpu.memory_space<vmem>>, %arg9: memref<1x4x256xf32, #tpu.memory_space<vmem>>, %arg10: memref<1x4x256xf32, #tpu.memory_space<vmem>>) attributes {dimension_semantics = [#tpu.dimension_semantics<parallel>, #tpu.dimension_semantics<parallel>], iteration_bounds = array<i64: 2, 1>, scalar_prefetch = 0 : i64, scratch_operands = 0 : i64, tpu.core_type = #tpu.core_type<tc>, window_params = [{transform_indices = @transform_0, window_bounds = array<i64: 1, 16, 256>}, {pipeline_mode = #tpu.pipeline_mode<synchronous>, transform_indices = @transform_1, window_bounds = array<i64: 32, 16>}, {pipeline_mode = #tpu.pipeline_mode<synchronous>, transform_indices = @transform_2, window_bounds = array<i64: 32, 1>}, {pipeline_mode = #tpu.pipeline_mode<synchronous>, transform_indices = @transform_3, window_bounds = array<i64: 4, 32>}, {pipeline_mode = #tpu.pipeline_mode<synchronous>, transform_indices = @transform_4, window_bounds = array<i64: 4, 1>}, {pipeline_mode = #tpu.pipeline_mode<synchronous>, transform_indices = @transform_5, window_bounds = array<i64: 16, 4>}, {transform_indices = @transform_6, window_bounds = array<i64: 1, 16, 256>}, {transform_indices = @transform_7, window_bounds = array<i64: 1, 4, 256>}, {transform_indices = @transform_8, window_bounds = array<i64: 1, 4, 256>}]} {
    %c0 = arith.constant 0 : index
    %c0_0 = arith.constant 0 : index
    %c0_1 = arith.constant 0 : index
    %0 = vector.load %arg2[%c0, %c0_0, %c0_1] : memref<1x16x256xf32, #tpu.memory_space<vmem>>, vector<1x16x256xf32>
    %1 = vector.shape_cast %0 : vector<1x16x256xf32> to vector<16x256xf32>
    %c0_2 = arith.constant 0 : index
    %c0_3 = arith.constant 0 : index
    %2 = vector.load %arg3[%c0_2, %c0_3] : memref<32x16xf32, #tpu.memory_space<vmem>>, vector<32x16xf32>
    %cst = arith.constant dense<0.000000e+00> : vector<32x256xf32>
    %3 = tpu.matmul %2, %1, %cst {dimension_numbers = #tpu.dot_dimension_numbers<[1], [0], [0], [1], [0, 0, 1, 1], [], []>} : vector<32x16xf32>, vector<16x256xf32>, vector<32x256xf32> -> vector<32x256xf32>
    %c0_4 = arith.constant 0 : index
    %c0_5 = arith.constant 0 : index
    %4 = vector.load %arg4[%c0_4, %c0_5] : memref<32x1xf32, #tpu.memory_space<vmem>>, vector<32x1xf32>
    %5 = vector.broadcast %4 : vector<32x1xf32> to vector<32x256xf32>
    %6 = arith.addf %3, %5 : vector<32x256xf32>
    %cst_6 = arith.constant 0.000000e+00 : f32
    %7 = vector.broadcast %cst_6 : f32 to vector<32x256xf32>
    %8 = arith.maximumf %6, %7 : vector<32x256xf32>
    %c0_7 = arith.constant 0 : index
    %c0_8 = arith.constant 0 : index
    %9 = vector.load %arg5[%c0_7, %c0_8] : memref<4x32xf32, #tpu.memory_space<vmem>>, vector<4x32xf32>
    %cst_9 = arith.constant dense<0.000000e+00> : vector<4x256xf32>
    %10 = tpu.matmul %9, %8, %cst_9 {dimension_numbers = #tpu.dot_dimension_numbers<[1], [0], [0], [1], [0, 0, 1, 1], [], []>} : vector<4x32xf32>, vector<32x256xf32>, vector<4x256xf32> -> vector<4x256xf32>
    %c0_10 = arith.constant 0 : index
    %c0_11 = arith.constant 0 : index
    %11 = vector.load %arg6[%c0_10, %c0_11] : memref<4x1xf32, #tpu.memory_space<vmem>>, vector<4x1xf32>
    %12 = vector.broadcast %11 : vector<4x1xf32> to vector<4x256xf32>
    %13 = arith.addf %10, %12 : vector<4x256xf32>
    %cst_12 = arith.constant 0.000000e+00 : f32
    %14 = vector.broadcast %cst_12 : f32 to vector<4x256xf32>
    %15 = arith.maximumf %13, %14 : vector<4x256xf32>
    %16 = vector.broadcast %cst_12 : f32 to vector<4x256xf32>
    %17 = arith.subf %13, %16 : vector<4x256xf32>
    %18 = arith.cmpf one, %17, %17 : vector<4x256xf32>
    %19 = vector.broadcast %cst_12 : f32 to vector<4x256xf32>
    %20 = arith.addf %13, %19 : vector<4x256xf32>
    %21 = math.absf %17 : vector<4x256xf32>
    %cst_13 = arith.constant 0.000000e+00 : f32
    %22 = vector.broadcast %cst_13 : f32 to vector<4x256xf32>
    %23 = arith.subf %22, %21 : vector<4x256xf32>
    %24 = math.exp %23 : vector<4x256xf32>
    %25 = math.log1p %24 : vector<4x256xf32>
    %26 = arith.addf %15, %25 : vector<4x256xf32>
    %27 = arith.select %18, %20, %26 : vector<4x256xi1>, vector<4x256xf32>
    %cst_14 = arith.constant 1.000000e-03 : f32
    %28 = vector.broadcast %cst_14 : f32 to vector<4x256xf32>
    %29 = arith.addf %27, %28 : vector<4x256xf32>
    %cst_15 = arith.constant dense<0.000000e+00> : vector<256xf32>
    %30 = vector.multi_reduction <add>, %29, %cst_15 [0] : vector<4x256xf32> to vector<256xf32>
    %31 = vector.shape_cast %30 : vector<256xf32> to vector<1x256xf32>
    %32 = tpu.reciprocal %31 : vector<1x256xf32> -> vector<1x256xf32>
    %33 = vector.broadcast %32 : vector<1x256xf32> to vector<4x256xf32>
    %34 = arith.mulf %29, %33 : vector<4x256xf32>
    %c0_16 = arith.constant 0 : index
    %c0_17 = arith.constant 0 : index
    %35 = vector.load %arg7[%c0_16, %c0_17] : memref<16x4xf32, #tpu.memory_space<vmem>>, vector<16x4xf32>
    %cst_18 = arith.constant dense<0.000000e+00> : vector<16x256xf32>
    %36 = tpu.matmul %35, %34, %cst_18 {dimension_numbers = #tpu.dot_dimension_numbers<[1], [0], [0], [1], [0, 0, 1, 1], [], []>} : vector<16x4xf32>, vector<4x256xf32>, vector<16x256xf32> -> vector<16x256xf32>
    %c0_19 = arith.constant 0 : index
    %c0_20 = arith.constant 0 : index
    %c0_21 = arith.constant 0 : index
    %37 = vector.load %arg8[%c0_19, %c0_20, %c0_21] : memref<1x16x256xf32, #tpu.memory_space<vmem>>, vector<1x16x256xf32>
    %38 = vector.shape_cast %37 : vector<1x16x256xf32> to vector<16x256xf32>
    %39 = vector.shape_cast %36 : vector<16x256xf32> to vector<1x16x256xf32>
    tpu.vector_store %arg8[%c0_19, %c0_20, %c0_21], %39 {strides = array<i32>} : memref<1x16x256xf32, #tpu.memory_space<vmem>>, vector<1x16x256xf32>,
    %c0_22 = arith.constant 0 : index
    %c0_23 = arith.constant 0 : index
    %c0_24 = arith.constant 0 : index
    %40 = vector.load %arg9[%c0_22, %c0_23, %c0_24] : memref<1x4x256xf32, #tpu.memory_space<vmem>>, vector<1x4x256xf32>
    %41 = vector.shape_cast %40 : vector<1x4x256xf32> to vector<4x256xf32>
    %42 = vector.shape_cast %34 : vector<4x256xf32> to vector<1x4x256xf32>
    tpu.vector_store %arg9[%c0_22, %c0_23, %c0_24], %42 {strides = array<i32>} : memref<1x4x256xf32, #tpu.memory_space<vmem>>, vector<1x4x256xf32>,
    %c0_25 = arith.constant 0 : index
    %c0_26 = arith.constant 0 : index
    %c0_27 = arith.constant 0 : index
    %43 = vector.load %arg10[%c0_25, %c0_26, %c0_27] : memref<1x4x256xf32, #tpu.memory_space<vmem>>, vector<1x4x256xf32>
    %44 = vector.shape_cast %43 : vector<1x4x256xf32> to vector<4x256xf32>
    %45 = vector.shape_cast %29 : vector<4x256xf32> to vector<1x4x256xf32>
    tpu.vector_store %arg10[%c0_25, %c0_26, %c0_27], %45 {strides = array<i32>} : memref<1x4x256xf32, #tpu.memory_space<vmem>>, vector<1x4x256xf32>,
    return
  }
  func.func @transform_0(%arg0: i32, %arg1: i32) -> (i32, i32, i32) {
    %c0_i32 = arith.constant 0 : i32
    %c0_i32_0 = arith.constant 0 : i32
    return %arg0, %c0_i32, %arg1 : i32, i32, i32
  }
  func.func @transform_1(%arg0: i32, %arg1: i32) -> (i32, i32) {
    %c0_i32 = arith.constant 0 : i32
    %c0_i32_0 = arith.constant 0 : i32
    %c0_i32_1 = arith.constant 0 : i32
    return %c0_i32, %c0_i32_0 : i32, i32
  }
  func.func @transform_2(%arg0: i32, %arg1: i32) -> (i32, i32) {
    %c0_i32 = arith.constant 0 : i32
    %c0_i32_0 = arith.constant 0 : i32
    %c0_i32_1 = arith.constant 0 : i32
    return %c0_i32, %c0_i32_0 : i32, i32
  }
  func.func @transform_3(%arg0: i32, %arg1: i32) -> (i32, i32) {
    %c0_i32 = arith.constant 0 : i32
    %c0_i32_0 = arith.constant 0 : i32
    %c0_i32_1 = arith.constant 0 : i32
    return %c0_i32, %c0_i32_0 : i32, i32
  }
  func.func @transform_4(%arg0: i32, %arg1: i32) -> (i32, i32) {
    %c0_i32 = arith.constant 0 : i32
    %c0_i32_0 = arith.constant 0 : i32
    %c0_i32_1 = arith.constant 0 : i32
    return %c0_i32, %c0_i32_0 : i32, i32
  }
  func.func @transform_5(%arg0: i32, %arg1: i32) -> (i32, i32) {
    %c0_i32 = arith.constant 0 : i32
    %c0_i32_0 = arith.constant 0 : i32
    %c0_i32_1 = arith.constant 0 : i32
    return %c0_i32, %c0_i32_0 : i32, i32
  }
  func.func @transform_6(%arg0: i32, %arg1: i32) -> (i32, i32, i32) {
    %c0_i32 = arith.constant 0 : i32
    %c0_i32_0 = arith.constant 0 : i32
    return %arg0, %c0_i32, %arg1 : i32, i32, i32
  }
  func.func @transform_7(%arg0: i32, %arg1: i32) -> (i32, i32, i32) {
    %c0_i32 = arith.constant 0 : i32
    %c0_i32_0 = arith.constant 0 : i32
    return %arg0, %c0_i32, %arg1 : i32, i32, i32
  }
  func.func @transform_8(%arg0: i32, %arg1: i32) -> (i32, i32, i32) {
    %c0_i32 = arith.constant 0 : i32
    %c0_i32_0 = arith.constant 0 : i32
    return %arg0, %c0_i32, %arg1 : i32, i32, i32
  }
}

</mosaic_0001>

<bundles_post_ra>
// kernel: tpu_custom_call.1
= control target key start
LH: loop header
LB: loop body
LE: loop exit
PB: predicated region body
PF: predicated region fallthrough
CT: control target
= control target key end

     0   :  { %s1403_s0 = inlined_call_operand.vmem [shape: f32[2,16,256], index: 0, kind: input, shape index: {}]   ;;  %s1404_s1 = inlined_call_operand.vmem [shape: f32[32,16], index: 1, kind: input, shape index: {}]   ;;  %s1405_s2 = inlined_call_operand.vmem [shape: f32[32,1], index: 2, kind: input, shape index: {}]   ;;  %s1406_s3 = inlined_call_operand.vmem [shape: f32[4,32], index: 3, kind: input, shape index: {}]   ;;  %s1407_s4 = inlined_call_operand.vmem [shape: f32[4,1], index: 4, kind: input, shape index: {}]   ;;  %s1408_s5 = inlined_call_operand.vmem [shape: f32[16,4], index: 5, kind: input, shape index: {}]   ;;  %s1409_s6 = inlined_call_operand.hbm [shape: f32[2,16,256], index: 6, kind: output, shape index: {0}]   ;;  %s1410_s7 = inlined_call_operand.hbm [shape: f32[2,4,256], index: 7, kind: output, shape index: {1}]   ;;  %s1411_s8 = inlined_call_operand.hbm [shape: f32[2,4,256], index: 8, kind: output, shape index: {2}]  }
   0x1   :  { %1413 = sst [smem:[#allocation9_spill]] %s1403_s0 }
   0x2   :  { %1414 = sst [smem:[#allocation10_spill]] %s1404_s1 }
   0x3   :  { %1415 = sst [smem:[#allocation11_spill]] %s1405_s2 }
   0x4   :  { %1416 = sst [smem:[#allocation12_spill]] %s1406_s3 }
   0x5   :  { %1417 = sst [smem:[#allocation13_spill]] %s1407_s4 }
   0x6   :  { %1418 = sst [smem:[#allocation14_spill]] %s1408_s5 }
   0x7   :  { %14 = vsyncpa [#allocation3], 0 }
   0x8   :  { %16 = vsyncpa [#allocation3 + $0x1], 0 }
   0x9   :  { %17 = vsyncpa [#allocation5], 0 }
   0xa   :  { %19 = vsyncpa [#allocation5 + $0x1], 0  ;;  %s1201_s27 = smov 0   ;;  %s1203_s28 = smov 0  }
   0xb   :  { %s1205_s29 = smov 0   ;;  %s1207_s30 = smov 0  }
   0xc   :  { %s1209_s9 = smov 0   ;;  %s1211_s10 = smov 0  }
   0xd LB: > { %s889_s11 = sadd.s32 4294967295, %s1151_s10   ;;  %s1412_s12 = sadd.s32 4294967294, %s1151_s10   ;;  %s1151_s10 = sphi %s1211_s10, %s25_s10   ;;  %s1147_s9 = sphi %s1209_s9, %s1432_s9   ;;  %s1143_s30 = sphi %s1207_s30, %s1431_s30   ;;  %s1139_s29 = sphi %s1205_s29, %s1430_s29   ;;  %s1135_s28 = sphi %s1203_s28, %s1429_s28   ;;  %s1131_s27 = sphi %s1201_s27, %s1428_s27  }
   0xe   : > { %s37_s13 = sadd.s32 1, %s1147_s9  ;;  %s179_s14 = sadd.s32 1, %s1139_s29 }
   0xf   : > { %p39_p0 = scmp.ge.s32.totalorder %s37_s13, 2  ;;  %p189_p1 = scmp.ne.s32.totalorder %s1139_s29, %s1135_s28 }
  0x10   : > { %p190_p2 = scmp.eq.s32.totalorder %s889_s11, 1  ;;  %p195_p3 = scmp.ne.s32.totalorder %s1135_s28, %s1131_s27 }
  0x11   : > { %s1434_s13 = smov (%p39_p0, %s37_s13), 0  ;;  %p196_p5 = scmp.eq.s32.totalorder %s1412_s12, 1 }
  0x12   : > { %p1243_p4 = por %p190_p2, %p189_p1  ;;  %s174_s16 = ssub.s32 %s1147_s9, %s1434_s13 }
  0x13   : > { %p893_p6 = scmp.ge.s32.totalorder %s1151_s10, 1  ;;  %p177_p7 = scmp.eq.s32.totalorder %s174_s16, 0 }
  0x14   : > { %p1252_p8 = por %p196_p5, %p195_p3  ;;  %p298_p9 = scmp.lt.s32.totalorder %s1151_s10, 3 }
  0x15   : > { %s1258_s18 = scalar_select %p177_p7, %s1139_s29, %s179_s14  }
  0x16   : > { %p299_p10 = pnand %p893_p6, %p298_p9 }
  0x17   : > { %p347_p11 = scmp.lt.s32.totalorder (!%p299_p10), %s1143_s30, 1  ;;  %s1421_s2 = sld [smem:[#allocation11_spill]] (!%p299_p10) }
  0x18   : > { %302 = sbr.rel (%p299_p10) target bundleno = 540 (0x21c), region = 44  ;;  %s1422_s0 = sld [smem:[#allocation9_spill]] (!%p299_p10) }
  0x19   : > { %s1423_s1 = sld [smem:[#allocation10_spill]] (!%p299_p10)  ;;  %s928_s22 = sshll.u32 (!%p299_p10), %s1143_s30, 3 }
  0x1a   : > { %s1424_s4 = sld [smem:[#allocation13_spill]] (!%p299_p10)  ;;  %s722_s16 = scalar_lea.hbm (!%p299_p10), %s1410_s7, %s928_s22 }
  0x1b   : > { %s1425_s3 = sld [smem:[#allocation12_spill]] (!%p299_p10)  ;;  %s1332_s12 = sand.u32 (!%p299_p10), 1, %s889_s11  }
  0x1c   : > { %s1426_s5 = sld [smem:[#allocation14_spill]] (!%p299_p10)  ;;  %s739_s20 = scalar_lea.hbm (!%p299_p10), %s1411_s8, %s928_s22 }
  0x1d   : > { %v368_v0 = vld [vmem:[%s1421_s2 + $0x8] sm:$0xff]  ;;  %v1153_v1 = vmov 0   ;;  %v370_v2 = vld [vmem:[%s1421_s2 + $0x18] sm:$0xff]  ;;  %s348_s23 = scalar_select %p347_p11, %s1143_s30, 1  ;;  %vm391_vm0 = vcmask 130048   ;;  %v367_v8 = vld [vmem:[%s1421_s2] sm:$0xff] }
  0x1e   : > { %999 = vset.pattern.permute.xlu1 %v1153_v1  ;;  %998 = vset.pattern.permute.xlu0 %v1153_v1  ;;  %v369_v9 = vld [vmem:[%s1421_s2 + $0x10] sm:$0xff]  ;;  %vm477_vm1 = vcmask 261120   ;;  %vm559_vm6 = vcmask 1043456   ;;  %vm606_vm15 = vcmask 31744   ;;  %s685_s21 = scalar_lea.sflag [#allocation5], %s1332_s12 }
  0x1f   : > { %378 = vperm.xlu1 %999, %v368_v0   ;;  %388 = vperm.xlu0 %998, %v370_v2   ;;  %s926_s24 = sshll.u32 %s348_s23, 5  ;;  %v363_v7 = vld [vmem:[%s1423_s1] sm:$0xff]  ;;  %v364_v10 = vld [vmem:[%s1423_s1 + $0x8] sm:$0xff]  ;;  %v365_v11 = vld [vmem:[%s1423_s1 + $0x10] sm:$0xff] }
  0x20   : > { %1000 = vset.pattern.permute.xlu2 %v1153_v1  ;;  %s354_s14 = scalar_lea.vmem %s1422_s0, %s926_s24  ;;  %v366_v12 = vld [vmem:[%s1423_s1 + $0x18] sm:$0xff]  ;;  %v471_v15 = vld [vmem:[%s1424_s4] sm:$0xf]  ;;  %s1304_s24 = sand.u32 1, %s1135_s28  }
  0x21   : > { %v361_v3 = vld [vmem:[%s354_s14 + $0x10] sm:$0xff]  ;;  %v362_v4 = vld [vmem:[%s354_s14 + $0x18] sm:$0xff]  ;;  %v359_v5 = vld [vmem:[%s354_s14] sm:$0xff]  ;;  %474 = vperm.xlu2 %1000, %v471_v15   ;;  %s895_s25 = sshll.u32 %s1304_s24, 3 }
  0x22   : > { %418 = vmatpush.msra.mxu0 %v361_v3  ;;  %447 = vmatpush.msra.mxu1 %v362_v4  ;;  %v360_v6 = vld [vmem:[%s354_s14 + $0x8] sm:$0xff]  ;;  %v470_v42 = vld [vmem:[%s1425_s3] sm:$0xf]  ;;  %s1312_s26 = scalar_lea.vmem [#allocation6], %s895_s25  ;;  %s338_s19 = scalar_lea.vmem [#allocation4], %s895_s25 }
  0x23   : > { %s724_s0 = sshll.u32 %s338_s19, 4  ;;  %s726_s25 = sshll.u32 %s722_s16, 4  ;;  %s725_s0 = int_to_ptr.vmem [resolvable:$true] %s724_s0  ;;  %s727_s25 = int_to_ptr.hbm [resolvable:$true] %s726_s25 }
  0x24   : > { %419 = vmatpush.msra.mxu0 %v359_v5  ;;  %448 = vmatpush.msra.mxu1 %v360_v6  ;;  %s1027_s3 = sshra.s32 %s727_s25, 4  ;;  %s1033_s14 = scalar_lea.hbm %s1410_s7, 16  ;;  %s1028_s3 = int_to_ptr.hbm [resolvable:$true] %s1027_s3 }
  0x25   : > { %899 = vmatmul.msk.f32.vlgmr.msra.gmra.mxu0 %vm391_vm0, %v363_v7  ;;  %903 = vmatmul.msk.f32.vlgmr.msra.gmra.mxu1 %vm391_vm0, %v363_v7  ;;  %s1029_s4 = scalar_lea.hbm %s1028_s3, 8  ;;  %p1034_p1 = scmp.lt.s32.totalorder %s1028_s3, %s1410_s7 }
  0x26   : > { %p1030_p12 = scmp.ne.s32.totalorder %s1028_s3, %s1029_s4  ;;  %p1035_p2 = scmp.lt.s32.totalorder %s1033_s14, %s1029_s4 }
  0x27   : > { %373 = vperm.xlu1 %999, %v367_v8   ;;  %383 = vperm.xlu0 %998, %v369_v9  }
  0x28   : > { %p1031_p13 = pnand %p1030_p12, %p1243_p4  ;;  %p1036_p3 = por %p1035_p2, %p1034_p1 }
  0x2a   : > { %p1032_p0 = pneg %p1031_p13 }
  0x2c   : > { %p1037_p5 = pnand %p1036_p3, %p1032_p0 }
  0x2d   : > { %900 = vmatmul.msk.f32.gmra.mxu0 %vm391_vm0, %v364_v10  ;;  %904 = vmatmul.msk.f32.gmra.mxu1 %vm391_vm0, %v364_v10 }
  0x35   : > { %901 = vmatmul.msk.f32.gmra.mxu0 %vm391_vm0, %v365_v11  ;;  %905 = vmatmul.msk.f32.gmra.mxu1 %vm391_vm0, %v365_v11 }
  0x3d   : > { %902 = vmatmul.msk.f32.gmra.mxu0 %vm391_vm0, %v366_v12  ;;  %906 = vmatmul.msk.f32.gmra.mxu1 %vm391_vm0, %v366_v12 }
  0x7b   : > { %v475_v43 = vpop.permute.xlu2 %474 }
  0x91   : > { %v389_v18 = vpop.permute.xlu0 %388  ;;  %v379_v19 = vpop.permute.xlu1 %378 }
  0x99   : > { %v384_v22 = vpop.permute.xlu0 %383  ;;  %v374_v29 = vpop.permute.xlu1 %373 }
  0xa2   : > { %v421_v13 = vpop.f32.mrf.mxu0  ;;  %v450_v14 = vpop.f32.mrf.mxu1 }
  0xa3   : > { %v422_v34 = vadd.f32 %v421_v13, %v374_v29  ;;  %v451_v35 = vadd.f32 %v450_v14, %v374_v29 }
  0xa5   : > { %v462_v40 = vmax.f32 %v422_v34, 0.0  ;;  %v463_v41 = vmax.f32 %v451_v35, 0.0 }
  0xaa   : > { %v424_v16 = vpop.f32.mrf.mxu0  ;;  %v453_v17 = vpop.f32.mrf.mxu1 }
  0xab   : > { %v425_v30 = vadd.f32 %v424_v16, %v379_v19  ;;  %v454_v31 = vadd.f32 %v453_v17, %v379_v19 }
  0xad   : > { %v464_v38 = vmax.f32 %v425_v30, 0.0  ;;  %v465_v39 = vmax.f32 %v454_v31, 0.0 }
  0xb2   : > { %v427_v20 = vpop.f32.mrf.mxu0  ;;  %v456_v21 = vpop.f32.mrf.mxu1 }
  0xb3   : > { %v428_v25 = vadd.f32 %v427_v20, %v384_v22  ;;  %v457_v26 = vadd.f32 %v456_v21, %v384_v22 }
  0xb5   : > { %v466_v36 = vmax.f32 %v428_v25, 0.0  ;;  %v467_v37 = vmax.f32 %v457_v26, 0.0 }
  0xba   : > { %v430_v23 = vpop.f32.mrf.mxu0  ;;  %v459_v24 = vpop.f32.mrf.mxu1 }
  0xbb   : > { %v431_v27 = vadd.f32 %v430_v23, %v389_v18  ;;  %v460_v28 = vadd.f32 %v459_v24, %v389_v18 }
  0xbd   : > { %v468_v32 = vmax.f32 %v431_v27, 0.0  ;;  %v469_v33 = vmax.f32 %v460_v28, 0.0 }
  0xbf   : > { %493 = vmatpush.msra.mxu2 %v468_v32  ;;  %513 = vmatpush.msra.mxu3 %v469_v33 }
  0xc1   : > { %494 = vmatpush.msra.mxu2 %v466_v36  ;;  %514 = vmatpush.msra.mxu3 %v467_v37 }
  0xc3   : > { %495 = vmatpush.msra.mxu2 %v464_v38  ;;  %515 = vmatpush.msra.mxu3 %v465_v39 }
  0xc5   : > { %496 = vmatpush.msra.mxu2 %v462_v40  ;;  %516 = vmatpush.msra.mxu3 %v463_v41 }
  0xc6   : > { %907 = vmatmul.msk.f32.vlgmr.msra.gmra.mxu2 %vm477_vm1, %v470_v42  ;;  %908 = vmatmul.msk.f32.vlgmr.msra.gmra.mxu3 %vm477_vm1, %v470_v42 }
 0x149   : > { %v498_v44 = vpop.f32.mrf.mxu2  ;;  %v518_v45 = vpop.f32.mrf.mxu3 }
 0x14a   : > { %v499_v46 = vadd.f32 %v498_v44, %v475_v43  ;;  %v519_v47 = vadd.f32 %v518_v45, %v475_v43 }
 0x14c   : > { %v527_v48 = vand.u32 2147483647, %v499_v46  ;;  %v528_v49 = vand.u32 2147483647, %v519_v47  ;;  %v521_v4 = vmax.f32 %v499_v46, 0.0  ;;  %v522_v8 = vmax.f32 %v519_v47, 0.0 }
 0x14d   : > { %vm523_vm4 = vcmp.ne.f32.partialorder %v499_v46, %v499_v46  ;;  %vm524_vm5 = vcmp.ne.f32.partialorder %v519_v47, %v519_v47 }
 0x14e   : > { %v529_v50 = vsub.f32 0.0, %v527_v48  ;;  %v530_v51 = vsub.f32 0.0, %v528_v49 }
 0x150   : > { %v531_v52 = vmul.f32 1.442695, %v529_v50  ;;  %v533_v53 = vmul.f32 1.442695, %v530_v51 }
 0x152   : > { %1001 = vpow2.f32 %v531_v52 }
 0x153   : > { %1003 = vpow2.f32 %v533_v53  ;;  %v604_v53 = vld [vmem:[%s1426_s5] sm:$0xff] }
 0x158   : > { %v1002_v54 = vpop.eup %1001 }
 0x159   : > { %v1004_v55 = vpop.eup %1003  ;;  %v535_v56 = vadd.f32 1.0, %v1002_v54  ;;  %v538_v57 = vmul.f32 -0.5, %v1002_v54  ;;  %v541_v61 = vand.u32 2147483647, %v1002_v54 }
 0x15a   : > { %v544_v58 = vadd.f32 1.0, %v1004_v55  ;;  %v547_v59 = vmul.f32 -0.5, %v1004_v55  ;;  %v550_v63 = vand.u32 2147483647, %v1004_v55 }
 0x15b   : > { %1005 = vlog2.f32 %v535_v56  ;;  %v539_v60 = vadd.f32 1.0, %v538_v57  ;;  %vm542_vm2 = vcmp.lt.f32.partialorder %v541_v61, 0.0004427343  ;;  %v605_v57 = vld [vmem:[%s1426_s5 + $0x8] sm:$0xff] }
 0x15c   : > { %1007 = vlog2.f32 %v544_v58  ;;  %v548_v62 = vadd.f32 1.0, %v547_v59  ;;  %vm551_vm3 = vcmp.lt.f32.partialorder %v550_v63, 0.0004427343 }
 0x15d   : > { %v540_v3 = vmul.f32 %v1002_v54, %v539_v60 }
 0x15e   : > { %v549_v6 = vmul.f32 %v1004_v55, %v548_v62 }
 0x161   : > { %v1006_v0 = vpop.eup %1005 }
 0x162   : > { %v1008_v1 = vpop.eup %1007  ;;  %v537_v2 = vmul.f32 0.6931472, %v1006_v0 }
 0x163   : > { %v546_v5 = vmul.f32 0.6931472, %v1008_v1 }
 0x164   : > { %v543_v7 = vsel %vm542_vm2, %v540_v3, %v537_v2 }
 0x165   : > { %v553_v9 = vadd.f32 %v543_v7, %v521_v4  ;;  %v552_v10 = vsel %vm551_vm3, %v549_v6, %v546_v5 }
 0x166   : > { %v554_v11 = vadd.f32 %v552_v10, %v522_v8 }
 0x167   : > { %v555_v12 = vsel %vm523_vm4, %v499_v46, %v553_v9 }
 0x168   : > { %v556_v13 = vsel %vm524_vm5, %v519_v47, %v554_v11  ;;  %v557_v14 = vadd.f32 0.001, %v555_v12 }
 0x169   : > { %v558_v15 = vadd.f32 0.001, %v556_v13 }
 0x16a   : > { %v560_v16 = vsel %vm559_vm6, %v557_v14, 0.0 }
 0x16b   : > { %v561_v17 = vrot.slane %v560_v16, 4  ;;  %v567_v18 = vsel %vm559_vm6, %v558_v15, 0.0  ;;  %v675_v19 = vrot.slane %v558_v15, 4 }
 0x16c   : > { %v568_v20 = vrot.slane %v567_v18, 4 }
 0x16d   : > { %v562_v21 = vadd.f32 %v561_v17, %v560_v16  ;;  %v676_v22 = vsel %vm559_vm6, %v557_v14, %v675_v19 }
 0x16e   : > { %v569_v23 = vadd.f32 %v568_v20, %v567_v18  ;;  %678 = vst [vmem:[%s1312_s26] sm:$0xff] %v676_v22 }
 0x16f   : > { %v563_v24 = vrot.slane %v562_v21, 2 }
 0x170   : > { %v570_v25 = vrot.slane %v569_v23, 2 }
 0x171   : > { %v564_v26 = vadd.f32 %v563_v24, %v562_v21 }
 0x172   : > { %v571_v27 = vadd.f32 %v570_v25, %v569_v23 }
 0x173   : > { %v565_v28 = vrot.slane %v564_v26, 1 }
 0x174   : > { %v572_v29 = vrot.slane %v571_v27, 1 }
 0x175   : > { %v566_v30 = vadd.f32 %v565_v28, %v564_v26 }
 0x176   : > { %v573_v31 = vadd.f32 %v572_v29, %v571_v27 }
 0x177   : > { %1009 = vrcp.f32 %v566_v30  ;;  %v585_v37 = vand.u32 2147483648, %v566_v30  ;;  %v583_v40 = vand.u32 2147483647, %v566_v30  ;;  %vm579_vm9 = vweird.f32 %v566_v30 }
 0x178   : > { %1011 = vrcp.f32 %v573_v31  ;;  %v599_v41 = vand.u32 2147483648, %v573_v31  ;;  %v597_v43 = vand.u32 2147483647, %v573_v31  ;;  %vm593_vm11 = vweird.f32 %v573_v31 }
 0x179   : > { %v586_v45 = vor.u32 1.1754944e-38, %v585_v37  ;;  %vm584_vm12 = vcmp.eq.f32.partialorder %v583_v40, 8.507059e+37 }
 0x17a   : > { %v600_v48 = vor.u32 1.1754944e-38, %v599_v41  ;;  %vm598_vm14 = vcmp.eq.f32.partialorder %v597_v43, 8.507059e+37 }
 0x17d   : > { %v1010_v32 = vpop.eup %1009 }
 0x17e   : > { %v1012_v33 = vpop.eup %1011  ;;  %v575_v34 = vmul.f32 %v1010_v32, %v566_v30  ;;  %vm580_vm7 = vweird.f32 %v1010_v32 }
 0x17f   : > { %v589_v35 = vmul.f32 %v1012_v33, %v573_v31  ;;  %vm594_vm8 = vweird.f32 %v1012_v33  ;;  %vm581_vm10 = vmor %vm579_vm9, %vm580_vm7 }
 0x180   : > { %v576_v36 = vsub.f32 1.0, %v575_v34  ;;  %vm595_vm13 = vmor %vm593_vm11, %vm594_vm8 }
 0x181   : > { %v590_v38 = vsub.f32 1.0, %v589_v35 }
 0x182   : > { %v577_v39 = vmul.f32 %v1010_v32, %v576_v36 }
 0x183   : > { %v591_v42 = vmul.f32 %v1012_v33, %v590_v38 }
 0x184   : > { %v578_v44 = vadd.f32 %v1010_v32, %v577_v39 }
 0x185   : > { %v592_v46 = vadd.f32 %v1012_v33, %v591_v42 }
 0x186   : > { %v582_v47 = vsel %vm581_vm10, %v1010_v32, %v578_v44 }
 0x187   : > { %v587_v49 = vsel %vm584_vm12, %v586_v45, %v582_v47  ;;  %v596_v50 = vsel %vm595_vm13, %v1012_v33, %v592_v46 }
 0x188   : > { %v602_v51 = vmul.f32 %v587_v49, %v557_v14  ;;  %v601_v52 = vsel %vm598_vm14, %v600_v48, %v596_v50 }
 0x189   : > { %v603_v54 = vmul.f32 %v601_v52, %v558_v15 }
 0x18a   : > { %909 = vmatpush.msk.msrb.mxu2 %vm559_vm6, %v602_v51 }
 0x18b   : > { %912 = vmatpush.msk.msrb.mxu3 %vm559_vm6, %v603_v54  ;;  %v669_v55 = vrot.slane %v603_v54, 4  ;;  %910 = vmatmul.msk.f32.vlgmr.msrb.gmra.mxu2 %vm606_vm15, %v604_v53 }
 0x18c   : > { %913 = vmatmul.msk.f32.vlgmr.msrb.gmra.mxu3 %vm606_vm15, %v604_v53 }
 0x18d   : > { %v670_v56 = vsel %vm559_vm6, %v602_v51, %v669_v55 }
 0x18e   : > { %672 = vst [vmem:[%s338_s19] sm:$0xff] %v670_v56 }
 0x193   : > { %911 = vmatmul.msk.f32.gmra.mxu2 %vm606_vm15, %v605_v57 }
 0x194   : > { %914 = vmatmul.msk.f32.gmra.mxu3 %vm606_vm15, %v605_v57 }
 0x195   : > { %1040 = shalt.err (!%p1037_p5)
}
 0x196   : > { %931 = dma.vmem_to_hbm [thread:$0]  (%p1243_p4), %s725_s0, 128, %s727_s25, %s685_s21  }
 0x197   : > { %s741_s1 = sshll.u32 %s1312_s26, 4  ;;  %s743_s2 = sshll.u32 %s739_s20, 4  ;;  %s742_s1 = int_to_ptr.vmem [resolvable:$true] %s741_s1  ;;  %s744_s2 = int_to_ptr.hbm [resolvable:$true] %s743_s2 }
 0x198   : > { %s1055_s22 = sshra.s32 %s744_s2, 4  ;;  %s1061_s5 = scalar_lea.hbm %s1411_s8, 16  ;;  %s1056_s22 = int_to_ptr.hbm [resolvable:$true] %s1055_s22 }
 0x199   : > { %s1057_s16 = scalar_lea.hbm %s1056_s22, 8  ;;  %p1062_p10 = scmp.lt.s32.totalorder %s1056_s22, %s1411_s8 }
 0x19a   : > { %p1058_p6 = scmp.ne.s32.totalorder %s1056_s22, %s1057_s16  ;;  %p1063_p11 = scmp.lt.s32.totalorder %s1061_s5, %s1057_s16 }
 0x19c   : > { %p1059_p7 = pnand %p1058_p6, %p1243_p4  ;;  %p1064_p12 = por %p1063_p11, %p1062_p10 }
 0x19e   : > { %p1060_p9 = pneg %p1059_p7 }
 0x1a0   : > { %p1065_p13 = pnand %p1064_p12, %p1060_p9 }
 0x1a2   : > { %1068 = shalt.err (!%p1065_p13)
}
 0x1a3   : > { %932 = dma.vmem_to_hbm [thread:$0]  (%p1243_p4), %s742_s1, 128, %s744_s2, %s685_s21  }
 0x1a4   : > { %s894_s0 = sshll.u32 %s1304_s24, 5  ;;  %s927_s26 = sshll.u32 %s1143_s30, 5 }
 0x1a5   : > { %s331_s25 = scalar_lea.vmem [#allocation2], %s894_s0  ;;  %s703_s19 = scalar_lea.hbm %s1409_s6, %s927_s26 }
 0x1a6   : > { %s704_s22 = sshll.u32 %s331_s25, 4  ;;  %s706_s16 = sshll.u32 %s703_s19, 4  ;;  %s705_s22 = int_to_ptr.vmem [resolvable:$true] %s704_s22  ;;  %s707_s16 = int_to_ptr.hbm [resolvable:$true] %s706_s16 }
 0x1a7   : > { %s680_s12 = scalar_lea.sflag [#allocation3], %s1304_s24  ;;  %s1083_s30 = sshra.s32 %s707_s16, 4  ;;  %s1084_s30 = int_to_ptr.hbm [resolvable:$true] %s1083_s30 }
 0x1a8   : > { %s1085_s21 = scalar_lea.hbm %s1084_s30, 32  ;;  %s1089_s3 = scalar_lea.hbm %s1409_s6, 64 }
 0x1a9   : > { %p1086_p0 = scmp.ne.s32.totalorder %s1084_s30, %s1085_s21  ;;  %p1090_p3 = scmp.lt.s32.totalorder %s1084_s30, %s1409_s6 }
 0x1aa   : > { %p1091_p5 = scmp.lt.s32.totalorder %s1089_s3, %s1085_s21 }
 0x1ab   : > { %p1087_p1 = pnand %p1086_p0, %p1243_p4 }
 0x1ac   : > { %p1092_p6 = por %p1091_p5, %p1090_p3 }
 0x1ad   : > { %p1088_p2 = pneg %p1087_p1 }
 0x1af   : > { %p1093_p7 = pnand %p1092_p6, %p1088_p2 }
 0x20e   : > { %v636_v58 = vpop.f32.mrf.mxu2 }
 0x20f   : > { %665 = vst [vmem:[%s331_s25] sm:$0xff] %v636_v58  ;;  %v659_v59 = vpop.f32.mrf.mxu3 }
 0x210   : > { %666 = vst [vmem:[%s331_s25 + $0x8] sm:$0xff] %v659_v59 }
 0x216   : > { %v639_v60 = vpop.f32.mrf.mxu2 }
 0x217   : > { %667 = vst [vmem:[%s331_s25 + $0x10] sm:$0xff] %v639_v60  ;;  %v662_v61 = vpop.f32.mrf.mxu3 }
 0x218   : > { %668 = vst [vmem:[%s331_s25 + $0x18] sm:$0xff] %v662_v61 }
 0x219   : > { %1096 = shalt.err (!%p1093_p7)
}
 0x21a   : > { %s1154_s24 = smov 256   ;;  %s1155_s23 = smov 16  }
 0x21b   : > { %930 = dma.vmem_to_hbm [thread:$0]  (%p1243_p4), %s705_s22, 512, %s707_s16, %s680_s12, %s1154_s24, %s1154_s24, %s1155_s23  }
 0x21c PF: > { %p946_p9 = scmp.ge.s32.totalorder %s1151_s10, 2  ;;  %s755_s11 = sand.u32 1, %s1131_s27  }
 0x21d   : > { %s756_s0 = scalar_lea.sflag [#allocation3], %s755_s11 }
 0x21e   : > { %p937_p10 = pnand %p946_p9, %p1252_p8 }
 0x220   : > { %p938_p11 = pneg %p937_p10 }
 0x222   : > { %1122 = dma.done.wait (%p938_p11), %s756_s0, 512  }
 0x223   : > { %1124 = vsyncadd (%p938_p11), %s756_s0, 4294966784  ;;  %s1427_s26 = sadd.s32 4294967294, %s1151_s10  }
 0x224   : > { %s765_s25 = sand.u32 1, %s1427_s26  }
 0x225   : > { %s766_s20 = scalar_lea.sflag [#allocation5], %s765_s25 }
 0x226   : > { %1126 = dma.done.wait (%p938_p11), %s766_s20, 256  }
 0x227   : > { %1128 = vsyncadd (%p938_p11), %s766_s20, 4294967040  ;;  %s25_s10 = sadd.s32 1, %s1151_s10   ;;  %s1428_s27 = smov %s1135_s28 }
 0x228   : > { %p22_p4 = scmp.ge.s32.totalorder %s25_s10, 4   ;;  %s1429_s28 = smov %s1139_s29 }
 0x229   : > { %s1430_s29 = smov %s1258_s18  ;;  %s1431_s30 = smov %s1147_s9 }
 0x22a   : > { %s1432_s9 = smov %s1434_s13  ;;  %24 = sbr.rel (!%p22_p4) target bundleno = 13 (0xd), region = 111 }
 0x22f   :  { %782 = vsyncpa [#allocation3], 1 }
 0x230   :  { %784 = vsyncpa [#allocation3 + $0x1], 1 }
 0x231   :  { %785 = vsyncpa [#allocation5], 1 }
 0x232   :  { %787 = vsyncpa [#allocation5 + $0x1], 1 }

</bundles_post_ra>
